<compile_context>
chip_gen: v7x
topology: tpu7x:2x2x1
jax: 0.10.0
libtpu: 0.0.40
codegen_flags: <defaults>
</compile_context>

<pallas_src>
import functools

import jax
import jax.numpy as jnp
import numpy as np
from jax.experimental import pallas as pl
from jax.experimental.pallas import tpu as pltpu


def _round_up(a, b):
    return ((a + b - 1) // b) * b


def _round_down(a, b):
    return (a // b) * b


def _mbstd_fused_kernel(x_ref, o_ref, acc_ref, *, f, tf, inv_gm1, inv_f):
    """One (m-tile, feature-tile) grid step over the fused (g, m, F + HW) output.

    x_ref:   (g, MB, TF) input features (original dtype).
    o_ref:   (g, MB, TF) output features; global lanes >= f carry the stat channel.
    acc_ref: (MB, 1) f32 running per-row sum of per-feature group-std.
    """
    fj = pl.program_id(1)
    base = fj * tf                           # global lane offset of this tile

    @pl.when(fj == 0)
    def _init():
        acc_ref[...] = jnp.zeros_like(acc_ref)

    g, mb, _ = x_ref.shape

    def _group_std(x32):                     # (g, mb, tf) f32 -> (mb, tf) f32
        mean = jnp.mean(x32, axis=0, keepdims=True)
        d = x32 - mean
        var = jnp.sum(d * d, axis=0) * inv_gm1     # unbiased (NaN for g == 1, as torch)
        return jnp.sqrt(var + 1e-8)

    # ---- pure-input tile: every lane is a real input feature ----------------
    @pl.when(base + tf <= f)
    def _pure_input():
        xq = x_ref[...]
        std = _group_std(xq.astype(jnp.float32))
        acc_ref[...] += jnp.sum(std, axis=-1, keepdims=True)
        o_ref[...] = xq

    # ---- straddle tile: last input lanes + first stat lanes (at most one) ---
    @pl.when(jnp.logical_and(base < f, base + tf > f))
    def _straddle():
        xq = x_ref[...]
        lane = jax.lax.broadcasted_iota(jnp.int32, (mb, tf), 1) + base
        feat2 = lane < f                                     # 2-D, broadcast over g
        std = _group_std(xq.astype(jnp.float32))
        acc_ref[...] += jnp.sum(jnp.where(feat2, std, 0.0), axis=-1, keepdims=True)
        # acc_ref is final here: all earlier feature tiles of this m-tile already ran.
        stat = (acc_ref[...] * inv_f).astype(o_ref.dtype)    # (mb, 1)
        stat_full = jnp.broadcast_to(stat[None, :, :], (g, mb, tf))
        o_ref[...] = jnp.where(feat2[None, :, :], xq, stat_full)

    # ---- pure-stat tile: every lane is past the input features --------------
    @pl.when(base >= f)
    def _pure_stat():
        stat = (acc_ref[...] * inv_f).astype(o_ref.dtype)    # (mb, 1), final
        o_ref[...] = jnp.broadcast_to(stat[None, :, :], (g, mb, tf))


def _mbstd_small_kernel(x_ref, o_ref, *, f, s, inv_gm1, inv_f):
    """Fallback for tiny feature counts (c*h*w < 128): one full block, no tiling."""
    x = x_ref[...].astype(jnp.float32)                       # (g, m, f)
    g, m, _ = x_ref.shape
    mean = jnp.mean(x, axis=0, keepdims=True)
    d = x - mean
    var = jnp.sum(d * d, axis=0) * inv_gm1
    std = jnp.sqrt(var + 1e-8)                               # (m, f)
    stat = (jnp.sum(std, axis=-1, keepdims=True) * inv_f).astype(o_ref.dtype)
    o_ref[:, :, 0:f] = x_ref[...]
    o_ref[:, :, f:f + s] = jnp.broadcast_to(stat[None, :, :], (g, m, s))


def minibatch_std(x, group_size=4):
    """Pallas implementation of MinibatchStd.forward.  x: (b, c, h, w) NCHW."""
    b, c, h, w = x.shape
    g = min(b, group_size)
    if b % g != 0:
        g = b
    m = b // g
    s = h * w
    f = c * s
    f_out = f + s
    dtype = x.dtype

    # torch.var(unbiased=True) yields NaN for g == 1; intentionally reproduced.
    inv_gm1 = (1.0 / (g - 1)) if g > 1 else float("nan")
    inv_f = 1.0 / f

    x2 = x.reshape(g, m, f)             # free row-major view (batch = gi*m + mi)

    if f < 128:
        out3 = pl.pallas_call(
            functools.partial(_mbstd_small_kernel, f=f, s=s,
                              inv_gm1=inv_gm1, inv_f=inv_f),
            out_shape=jax.ShapeDtypeStruct((g, m, f_out), dtype),
            grid=(1,),
            in_specs=[pl.BlockSpec((g, m, f), lambda i: (0, 0, 0))],
            out_specs=pl.BlockSpec((g, m, f_out), lambda i: (0, 0, 0)),
            compiler_params=pltpu.CompilerParams(
                dimension_semantics=("arbitrary",)),
        )(x2)
        return out3.reshape(b, c + 1, h, w)

    # ---- main tiled / fused path --------------------------------------------
    itemsize = jnp.dtype(dtype).itemsize
    sub = {4: 8, 2: 16, 1: 32}.get(itemsize, 8)       # sublane packing factor

    # m-tile: full m when it already fits one sublane pack; otherwise sublane
    # multiples sized so the "parallel" axis gets >= 2 blocks (v7x megacore).
    if m <= sub:
        mb = m
    else:
        mb = max(sub, _round_down(m // 2, sub))
        mb = min(mb, 32)
    mbp = _round_up(mb, sub)                           # padded sublanes per g slice

    # Lane tile: biggest multiple of 128 such that double-buffered in+out blocks
    # plus ~3 f32 full-block intermediates stay under ~12 MiB (padded accounting).
    budget = 12 * 1024 * 1024
    per_lane = g * mbp * (4 * itemsize + 3 * 4)
    tf = _round_down(max(budget // per_lane, 128), 128)
    tf = max(128, min(tf, 8192))
    tf = min(tf, max(128, _round_down(f_out, 128)))    # never exceed output extent

    nf_in = pl.cdiv(f, tf)        # feature tiles holding real input data
    nt = pl.cdiv(f_out, tf)       # grid tiles over the *output* feature axis
    nmt = pl.cdiv(m, mb)

    # Raise the scoped VMEM limit only when the (padded) footprint demands it
    # (e.g. pathological g = b with m = 1 and huge b).
    block_bytes = g * mbp * tf * itemsize
    need = 4 * block_bytes + 3 * g * mbp * tf * 4 + (2 << 20)
    cp_kwargs = dict(dimension_semantics=("parallel", "arbitrary"))
    if need > (14 << 20):
        cp_kwargs["vmem_limit_bytes"] = int(min(need + (8 << 20), 56 << 20))

    kernel = functools.partial(_mbstd_fused_kernel, f=f, tf=tf,
                               inv_gm1=inv_gm1, inv_f=inv_f)

    out3 = pl.pallas_call(
        kernel,
        out_shape=jax.ShapeDtypeStruct((g, m, f_out), dtype),
        # NOTE: feature axis (axis 1) must remain the innermost sequential axis;
        # the stat-finality argument in the kernel depends on it.
        grid=(nmt, nt),
        in_specs=[pl.BlockSpec(
            (g, mb, tf),
            # Pure-stat tiles (fj >= nf_in) re-point at the last real input
            # block; Pallas skips the re-DMA (same block index) and that
            # branch never reads x_ref.
            lambda mi, fj: (0, mi, jnp.minimum(fj, nf_in - 1)))],
        out_specs=pl.BlockSpec((g, mb, tf), lambda mi, fj: (0, mi, fj)),
        scratch_shapes=[pltpu.VMEM((mb, 1), jnp.float32)],
        compiler_params=pltpu.CompilerParams(**cp_kwargs),
    )(x2)
    return out3.reshape(b, c + 1, h, w)


def _reference(x, group_size=4):
    """Pure-JAX reference mirroring the PyTorch forward exactly."""
    b, c, h, w = x.shape
    g = min(b, group_size)
    if b % g != 0:
        g = b
    y = x.reshape(g, -1, c, h, w)
    y = jnp.var(y, axis=0, ddof=1)
    y = jnp.sqrt(y + 1e-8)
    y = y.mean(axis=(1, 2, 3))
    y = y.reshape(-1, 1, 1, 1)
    y = jnp.tile(y, (g, 1, h, w))
    return jnp.concatenate([x, y], axis=1)


def _check(key, shape, dtype=jnp.float32, group_size=4, rtol=1e-4, atol=1e-5):
    x = jax.random.normal(key, shape, dtype=jnp.float32)
    if dtype != jnp.float32:
        x = x.astype(dtype)
    out = jax.block_until_ready(minibatch_std(x, group_size=group_size))
    ref = _reference(x.astype(jnp.float32), group_size=group_size).astype(dtype)
    b, c, h, w = shape
    assert out.shape == (b, c + 1, h, w), out.shape
    assert out.dtype == x.dtype
    np.testing.assert_allclose(np.asarray(out.astype(jnp.float32)),
                               np.asarray(ref.astype(jnp.float32)),
                               rtol=rtol, atol=atol)


if __name__ == "__main__":
    keys = jax.random.split(jax.random.PRNGKey(0), 5)
    # Primary small shape (single straddle tile).
    _check(keys[0], (8, 4, 16, 16))
    # Exercises pure-input + pure-stat branches and a ragged trailing output block.
    _check(keys[1], (8, 128, 8, 8))
    # b % group_size != 0  ->  g = b, m = 1.
    _check(keys[2], (6, 4, 8, 8))
    # Tiny feature count -> single-block fallback kernel.
    _check(keys[3], (8, 2, 4, 4))
    # bf16 input (sublane pack 16, f32 stats, bf16 output).
    _check(keys[4], (8, 16, 16, 16), dtype=jnp.bfloat16, rtol=2e-2, atol=2e-2)
    print("KERNEL_OK")
</pallas_src>

<mosaic_0001>
module attributes {stable_mosaic.version = 11 : i64} {
  func.func @_mbstd_fused_kernel(%arg0: i32, %arg1: i32, %arg2: memref<4x2x1280xf32, #tpu.memory_space<vmem>>, %arg3: memref<4x2x1280xf32, #tpu.memory_space<vmem>>, %arg4: memref<2x1xf32, #tpu.memory_space<vmem>>) attributes {dimension_semantics = [#tpu.dimension_semantics<parallel>, #tpu.dimension_semantics<arbitrary>], iteration_bounds = array<i64: 1, 1>, scalar_prefetch = 0 : i64, scratch_operands = 1 : i64, tpu.core_type = #tpu.core_type<tc>, window_params = [{transform_indices = @transform_0, window_bounds = array<i64: 4, 2, 1280>}, {transform_indices = @transform_1, window_bounds = array<i64: 4, 2, 1280>}]} {
    %c1280_i32 = arith.constant 1280 : i32
    %0 = arith.muli %arg1, %c1280_i32 : i32
    %c0_i32 = arith.constant 0 : i32
    %1 = arith.cmpi eq, %arg1, %c0_i32 : i32
    %2 = arith.extui %1 : i1 to i32
    %c0_i32_0 = arith.constant 0 : i32
    %3 = arith.cmpi ne, %2, %c0_i32_0 : i32
    scf.if %3 {
      %cst = arith.constant 0.000000e+00 : f32
      %17 = vector.broadcast %cst : f32 to vector<2x1xf32>
      %c0 = arith.constant 0 : index
      %c0_9 = arith.constant 0 : index
      %18 = vector.load %arg4[%c0, %c0_9] : memref<2x1xf32, #tpu.memory_space<vmem>>, vector<2x1xf32>
      tpu.vector_store %arg4[%c0, %c0_9], %17 {strides = array<i32>} : memref<2x1xf32, #tpu.memory_space<vmem>>, vector<2x1xf32>,
    } else {
    }
    %c1280_i32_1 = arith.constant 1280 : i32
    %4 = arith.addi %0, %c1280_i32_1 : i32
    %c1024_i32 = arith.constant 1024 : i32
    %5 = arith.cmpi sle, %4, %c1024_i32 : i32
    %6 = arith.extui %5 : i1 to i32
    %c0_i32_2 = arith.constant 0 : i32
    %7 = arith.cmpi ne, %6, %c0_i32_2 : i32
    scf.if %7 {
      %c0 = arith.constant 0 : index
      %c0_9 = arith.constant 0 : index
      %c0_10 = arith.constant 0 : index
      %17 = vector.load %arg2[%c0, %c0_9, %c0_10] : memref<4x2x1280xf32, #tpu.memory_space<vmem>>, vector<4x2x1280xf32>
      %cst = arith.constant dense<0.000000e+00> : vector<2x1280xf32>
      %18 = vector.multi_reduction <add>, %17, %cst [0] : vector<4x2x1280xf32> to vector<2x1280xf32>
      %19 = vector.shape_cast %18 : vector<2x1280xf32> to vector<1x2x1280xf32>
      %cst_11 = arith.constant 4.000000e+00 : f32
      %20 = vector.broadcast %cst_11 : f32 to vector<1x2x1280xf32>
      %21 = arith.divf %19, %20 : vector<1x2x1280xf32>
      %22 = vector.broadcast %21 : vector<1x2x1280xf32> to vector<4x2x1280xf32>
      %23 = arith.subf %17, %22 : vector<4x2x1280xf32>
      %24 = arith.mulf %23, %23 : vector<4x2x1280xf32>
      %cst_12 = arith.constant dense<0.000000e+00> : vector<2x1280xf32>
      %25 = vector.multi_reduction <add>, %24, %cst_12 [0] : vector<4x2x1280xf32> to vector<2x1280xf32>
      %cst_13 = arith.constant 0.333333343 : f32
      %26 = vector.broadcast %cst_13 : f32 to vector<2x1280xf32>
      %27 = arith.mulf %25, %26 : vector<2x1280xf32>
      %cst_14 = arith.constant 9.99999993E-9 : f32
      %28 = vector.broadcast %cst_14 : f32 to vector<2x1280xf32>
      %29 = arith.addf %27, %28 : vector<2x1280xf32>
      %30 = math.sqrt %29 : vector<2x1280xf32>
      %c0_15 = arith.constant 0 : index
      %c0_16 = arith.constant 0 : index
      %31 = vector.load %arg4[%c0_15, %c0_16] : memref<2x1xf32, #tpu.memory_space<vmem>>, vector<2x1xf32>
      %cst_17 = arith.constant dense<0.000000e+00> : vector<2xf32>
      %32 = vector.multi_reduction <add>, %30, %cst_17 [1] : vector<2x1280xf32> to vector<2xf32>
      %33 = vector.shape_cast %32 : vector<2xf32> to vector<2x1xf32>
      %34 = arith.addf %31, %33 : vector<2x1xf32>
      %c0_18 = arith.constant 0 : index
      %c0_19 = arith.constant 0 : index
      %35 = vector.load %arg4[%c0_18, %c0_19] : memref<2x1xf32, #tpu.memory_space<vmem>>, vector<2x1xf32>
      tpu.vector_store %arg4[%c0_18, %c0_19], %34 {strides = array<i32>} : memref<2x1xf32, #tpu.memory_space<vmem>>, vector<2x1xf32>,
      %c0_20 = arith.constant 0 : index
      %c0_21 = arith.constant 0 : index
      %c0_22 = arith.constant 0 : index
      %36 = vector.load %arg3[%c0_20, %c0_21, %c0_22] : memref<4x2x1280xf32, #tpu.memory_space<vmem>>, vector<4x2x1280xf32>
      tpu.vector_store %arg3[%c0_20, %c0_21, %c0_22], %17 {strides = array<i32>} : memref<4x2x1280xf32, #tpu.memory_space<vmem>>, vector<4x2x1280xf32>,
    } else {
    }
    %c1024_i32_3 = arith.constant 1024 : i32
    %8 = arith.cmpi slt, %0, %c1024_i32_3 : i32
    %c1280_i32_4 = arith.constant 1280 : i32
    %9 = arith.addi %0, %c1280_i32_4 : i32
    %c1024_i32_5 = arith.constant 1024 : i32
    %10 = arith.cmpi sgt, %9, %c1024_i32_5 : i32
    %11 = arith.andi %8, %10 : i1
    %12 = arith.extui %11 : i1 to i32
    %c0_i32_6 = arith.constant 0 : i32
    %13 = arith.cmpi ne, %12, %c0_i32_6 : i32
    scf.if %13 {
      %c0 = arith.constant 0 : index
      %c0_9 = arith.constant 0 : index
      %c0_10 = arith.constant 0 : index
      %17 = vector.load %arg2[%c0, %c0_9, %c0_10] : memref<4x2x1280xf32, #tpu.memory_space<vmem>>, vector<4x2x1280xf32>
      %18 = tpu.iota {dimensions = array<i32: 1>} : vector<2x1280xi32>
      %19 = vector.broadcast %0 : i32 to vector<2x1280xi32>
      %20 = arith.addi %18, %19 : vector<2x1280xi32>
      %c1024_i32_11 = arith.constant 1024 : i32
      %21 = vector.broadcast %c1024_i32_11 : i32 to vector<2x1280xi32>
      %22 = arith.cmpi slt, %20, %21 : vector<2x1280xi32>
      %cst = arith.constant dense<0.000000e+00> : vector<2x1280xf32>
      %23 = vector.multi_reduction <add>, %17, %cst [0] : vector<4x2x1280xf32> to vector<2x1280xf32>
      %24 = vector.shape_cast %23 : vector<2x1280xf32> to vector<1x2x1280xf32>
      %cst_12 = arith.constant 4.000000e+00 : f32
      %25 = vector.broadcast %cst_12 : f32 to vector<1x2x1280xf32>
      %26 = arith.divf %24, %25 : vector<1x2x1280xf32>
      %27 = vector.broadcast %26 : vector<1x2x1280xf32> to vector<4x2x1280xf32>
      %28 = arith.subf %17, %27 : vector<4x2x1280xf32>
      %29 = arith.mulf %28, %28 : vector<4x2x1280xf32>
      %cst_13 = arith.constant dense<0.000000e+00> : vector<2x1280xf32>
      %30 = vector.multi_reduction <add>, %29, %cst_13 [0] : vector<4x2x1280xf32> to vector<2x1280xf32>
      %cst_14 = arith.constant 0.333333343 : f32
      %31 = vector.broadcast %cst_14 : f32 to vector<2x1280xf32>
      %32 = arith.mulf %30, %31 : vector<2x1280xf32>
      %cst_15 = arith.constant 9.99999993E-9 : f32
      %33 = vector.broadcast %cst_15 : f32 to vector<2x1280xf32>
      %34 = arith.addf %32, %33 : vector<2x1280xf32>
      %35 = math.sqrt %34 : vector<2x1280xf32>
      %c0_16 = arith.constant 0 : index
      %c0_17 = arith.constant 0 : index
      %36 = vector.load %arg4[%c0_16, %c0_17] : memref<2x1xf32, #tpu.memory_space<vmem>>, vector<2x1xf32>
      %cst_18 = arith.constant 0.000000e+00 : f32
      %37 = vector.broadcast %cst_18 : f32 to vector<2x1280xf32>
      %38 = arith.select %22, %35, %37 : vector<2x1280xi1>, vector<2x1280xf32>
      %cst_19 = arith.constant dense<0.000000e+00> : vector<2xf32>
      %39 = vector.multi_reduction <add>, %38, %cst_19 [1] : vector<2x1280xf32> to vector<2xf32>
      %40 = vector.shape_cast %39 : vector<2xf32> to vector<2x1xf32>
      %41 = arith.addf %36, %40 : vector<2x1xf32>
      %c0_20 = arith.constant 0 : index
      %c0_21 = arith.constant 0 : index
      %42 = vector.load %arg4[%c0_20, %c0_21] : memref<2x1xf32, #tpu.memory_space<vmem>>, vector<2x1xf32>
      tpu.vector_store %arg4[%c0_20, %c0_21], %41 {strides = array<i32>} : memref<2x1xf32, #tpu.memory_space<vmem>>, vector<2x1xf32>,
      %c0_22 = arith.constant 0 : index
      %c0_23 = arith.constant 0 : index
      %43 = vector.load %arg4[%c0_22, %c0_23] : memref<2x1xf32, #tpu.memory_space<vmem>>, vector<2x1xf32>
      %cst_24 = arith.constant 9.765625E-4 : f32
      %44 = vector.broadcast %cst_24 : f32 to vector<2x1xf32>
      %45 = arith.mulf %43, %44 : vector<2x1xf32>
      %46 = vector.shape_cast %45 : vector<2x1xf32> to vector<1x2x1xf32>
      %47 = vector.shape_cast %46 : vector<1x2x1xf32> to vector<1x2x1xf32>
      %48 = vector.broadcast %47 : vector<1x2x1xf32> to vector<4x2x1280xf32>
      %49 = vector.shape_cast %22 : vector<2x1280xi1> to vector<1x2x1280xi1>
      %50 = vector.shape_cast %49 : vector<1x2x1280xi1> to vector<1x2x1280xi1>
      %51 = vector.broadcast %50 : vector<1x2x1280xi1> to vector<4x2x1280xi1>
      %52 = arith.select %51, %17, %48 : vector<4x2x1280xi1>, vector<4x2x1280xf32>
      %c0_25 = arith.constant 0 : index
      %c0_26 = arith.constant 0 : index
      %c0_27 = arith.constant 0 : index
      %53 = vector.load %arg3[%c0_25, %c0_26, %c0_27] : memref<4x2x1280xf32, #tpu.memory_space<vmem>>, vector<4x2x1280xf32>
      tpu.vector_store %arg3[%c0_25, %c0_26, %c0_27], %52 {strides = array<i32>} : memref<4x2x1280xf32, #tpu.memory_space<vmem>>, vector<4x2x1280xf32>,
    } else {
    }
    %c1024_i32_7 = arith.constant 1024 : i32
    %14 = arith.cmpi sge, %0, %c1024_i32_7 : i32
    %15 = arith.extui %14 : i1 to i32
    %c0_i32_8 = arith.constant 0 : i32
    %16 = arith.cmpi ne, %15, %c0_i32_8 : i32
    scf.if %16 {
      %c0 = arith.constant 0 : index
      %c0_9 = arith.constant 0 : index
      %17 = vector.load %arg4[%c0, %c0_9] : memref<2x1xf32, #tpu.memory_space<vmem>>, vector<2x1xf32>
      %cst = arith.constant 9.765625E-4 : f32
      %18 = vector.broadcast %cst : f32 to vector<2x1xf32>
      %19 = arith.mulf %17, %18 : vector<2x1xf32>
      %20 = vector.shape_cast %19 : vector<2x1xf32> to vector<1x2x1xf32>
      %21 = vector.shape_cast %20 : vector<1x2x1xf32> to vector<1x2x1xf32>
      %22 = vector.broadcast %21 : vector<1x2x1xf32> to vector<4x2x1280xf32>
      %c0_10 = arith.constant 0 : index
      %c0_11 = arith.constant 0 : index
      %c0_12 = arith.constant 0 : index
      %23 = vector.load %arg3[%c0_10, %c0_11, %c0_12] : memref<4x2x1280xf32, #tpu.memory_space<vmem>>, vector<4x2x1280xf32>
      tpu.vector_store %arg3[%c0_10, %c0_11, %c0_12], %22 {strides = array<i32>} : memref<4x2x1280xf32, #tpu.memory_space<vmem>>, vector<4x2x1280xf32>,
    } else {
    }
    return
  }
  func.func @transform_0(%arg0: i32, %arg1: i32) -> (i32, i32, i32) {
    %c0_i32 = arith.constant 0 : i32
    %0 = arith.minsi %arg1, %c0_i32 : i32
    %c0_i32_0 = arith.constant 0 : i32
    %c0_i32_1 = arith.constant 0 : i32
    return %c0_i32_0, %arg0, %0 : i32, i32, i32
  }
  func.func @transform_1(%arg0: i32, %arg1: i32) -> (i32, i32, i32) {
    %c0_i32 = arith.constant 0 : i32
    %c0_i32_0 = arith.constant 0 : i32
    return %c0_i32, %arg0, %arg1 : i32, i32, i32
  }
}

</mosaic_0001>

<bundles_post_ra>
// kernel: tpu_custom_call.1
= control target key start
LH: loop header
LB: loop body
LE: loop exit
PB: predicated region body
PF: predicated region fallthrough
CT: control target
= control target key end

     0   :  { %6 = vsyncpa [#allocation4], 0  ;;  %s2636_s0 = inlined_call_operand.hbm [shape: f32[4,2,1024], index: 0, kind: input, shape index: {}]   ;;  %s2637_s1 = inlined_call_operand.hbm [shape: f32[4,2,1280], index: 1, kind: output, shape index: {}]  }
   0x1   :  { %7 = vsyncpa [#allocation5], 0 }
   0x2   :  { %12 = vsyncadd [#allocation4], 256  ;;  %s2123_s6 = smov [#allocation3]   ;;  %s2075_s10 = scalar_lea.hbm %s2636_s0, 1024 }
   0x3   :  { %s13_s7 = sshll.u32 %s2123_s6, 4  ;;  %p2076_p0 = scmp.ne.s32.totalorder %s2636_s0, %s2075_s10  ;;  %s14_s7 = int_to_ptr.vmem [resolvable:$true] %s13_s7 }
   0x4   :  { %p2079_p1 = scmp.lt.u32.totalorder %s2075_s10, %s2636_s0 }
   0x6   :  { %p2081_p2 = pnand %p2079_p1, %p2076_p0 }
   0x8   :  { %2084 = shalt.err (!%p2081_p2)
}
   0x9   :  { %s2085_s15 = scalar_lea.vmem %s14_s7, 1024  ;;  %s2089_s16 = scalar_lea.vmem %s14_s7, 1280 }
   0xa   :  { %p2086_p3 = scmp.ne.s32.totalorder %s14_s7, %s2085_s15  ;;  %p2090_p4 = scmp.lt.s32.totalorder %s14_s7, %s14_s7 }
   0xb   :  { %p2091_p5 = scmp.lt.s32.totalorder %s2089_s16, %s2085_s15 }
   0xd   :  { %p2092_p6 = por %p2091_p5, %p2090_p4 }
   0xf   :  { %p2093_p7 = pnand %p2092_p6, %p2086_p3 }
  0x11   :  { %2096 = shalt.err (!%p2093_p7)
}
  0x12   :  { %s2124_s17 = smov 256   ;;  %s2125_s18 = smov 320  }
  0x13   :  { %s2126_s19 = smov 16  }
  0x14   :  { %19 = dma.hbm_to_vmem [thread:$0]  %s2636_s0, 1024, %s14_s7, [#allocation4], %s2124_s17, %s2125_s18, %s2126_s19  }
  0x15   :  { %2119 = dma.done.wait [#allocation4], 1280  }
  0x16   :  { %2120 = vsyncadd [#allocation4], 4294966016  ;;  %v911_v0 = vlaneseq  ;;  %vm28_vm0 = vcmask 1024   ;;  %v2127_v1 = vmov 1983009808   ;;  %v2128_v4 = vmov 0.0  }
  0x17   :  { %v909_v2 = vunpack.c.l.s4 %v2127_v1  ;;  %29 = vst.msk [vmem:[#allocation2] sm:$0x3] %vm28_vm0, %v2128_v4  ;;  %v2158_v7 = vld [vmem:[#allocation3] sm:$0xff]  ;;  %v2160_v8 = vld [vmem:[#allocation3 + $0x8] sm:$0xff]  ;;  %v2162_v9 = vld [vmem:[#allocation3 + $0x14] sm:$0xff]  ;;  %vm1115_vm1 = vcmask 1041408  }
  0x18   :  { %v912_v3 = vshrl.u32 %v911_v0, 7  ;;  %v2164_v10 = vld [vmem:[#allocation3 + $0x1c] sm:$0xff]  ;;  %v907_v11 = vcombine.high %v2158_v7, %v2158_v7  ;;  %v924_v13 = vcombine.high %v2160_v8, %v2160_v8  ;;  %v2178_v15 = vld [vmem:[#allocation3 + $0x28] sm:$0xff]  ;;  %v949_v16 = vcombine.high %v2162_v9, %v2162_v9  ;;  %v2192_v20 = vld [vmem:[#allocation3 + $0x30] sm:$0xff]  ;;  %s2130_s0 = smov [#allocation6]  }
  0x19   :  { %v910_v5 = vunpack.c.0.s8 %v909_v2  ;;  %v966_v18 = vcombine.high %v2164_v10, %v2164_v10  ;;  %v2208_v25 = vld [vmem:[#allocation3 + $0x3c] sm:$0xff]  ;;  %v2224_v30 = vld [vmem:[#allocation3 + $0x44] sm:$0xff]  ;;  %v991_v33 = vcombine.high %v2178_v15, %v2178_v15  ;;  %v1008_v37 = vcombine.high %v2192_v20, %v2192_v20  ;;  %s2025_s22 = sshll.u32 %s2130_s0, 4  ;;  %s2026_s22 = int_to_ptr.vmem [resolvable:$true] %s2025_s22 }
  0x1a   :  { %v1033_v41 = vcombine.high %v2208_v25, %v2208_v25  ;;  %v1050_v45 = vcombine.high %v2224_v30, %v2224_v30  ;;  %s2097_s23 = scalar_lea.vmem %s2026_s22, 1280  ;;  %p2102_p9 = scmp.lt.s32.totalorder %s2026_s22, %s2026_s22 }
  0x1b   :  { %v2156_v6 = vsub.s32 %v910_v5, %v912_v3  ;;  %p2098_p8 = scmp.ne.s32.totalorder %s2026_s22, %s2097_s23  ;;  %p2103_p10 = scmp.lt.s32.totalorder %s2097_s23, %s2097_s23 }
  0x1d   :  { %v2170_v12 = vrot.slane %v2158_v7, %v2156_v6  ;;  %v2176_v14 = vrot.slane %v2160_v8, %v2156_v6  ;;  %v2184_v17 = vrot.slane %v2162_v9, %v2156_v6  ;;  %v2190_v19 = vrot.slane %v2164_v10, %v2156_v6  ;;  %p2104_p11 = por %p2103_p10, %p2102_p9 }
  0x1e   :  { %v2195_v21 = vrot.slane %v907_v11, %v2156_v6  ;;  %v2202_v23 = vrot.slane %v924_v13, %v2156_v6  ;;  %v2211_v26 = vrot.slane %v949_v16, %v2156_v6  ;;  %v2218_v28 = vrot.slane %v966_v18, %v2156_v6 }
  0x1f   :  { %v2199_v22 = vcombine.high %v2170_v12, %v2170_v12  ;;  %v2206_v24 = vcombine.high %v2176_v14, %v2176_v14  ;;  %v2215_v27 = vcombine.high %v2184_v17, %v2184_v17  ;;  %v2222_v29 = vcombine.high %v2190_v19, %v2190_v19  ;;  %p2105_p12 = pnand %p2104_p11, %p2098_p8 }
  0x20   :  { %v2228_v31 = vcombine.high %v2195_v21, %v2195_v21  ;;  %v2232_v32 = vcombine.high %v2202_v23, %v2202_v23  ;;  %v2238_v34 = vrot.slane %v2178_v15, %v2156_v6  ;;  %v2242_v35 = vcombine.high %v2211_v26, %v2211_v26 }
  0x21   :  { %v2246_v36 = vcombine.high %v2218_v28, %v2218_v28  ;;  %v2252_v38 = vrot.slane %v2192_v20, %v2156_v6  ;;  %v2255_v39 = vrot.slane %v991_v33, %v2156_v6  ;;  %v2265_v42 = vrot.slane %v2208_v25, %v2156_v6 }
  0x22   :  { %v2259_v40 = vcombine.high %v2238_v34, %v2238_v34  ;;  %v2268_v43 = vrot.slane %v1008_v37, %v2156_v6  ;;  %v2278_v46 = vrot.slane %v2224_v30, %v2156_v6  ;;  %v2285_v48 = vrot.slane %v1033_v41, %v2156_v6 }
  0x23   :  { %v2272_v44 = vcombine.high %v2252_v38, %v2252_v38  ;;  %v2282_v47 = vcombine.high %v2255_v39, %v2255_v39  ;;  %v2289_v49 = vcombine.high %v2265_v42, %v2265_v42  ;;  %v1116_v50 = vsel %vm1115_vm1, %v2170_v12, 0.0 }
  0x24   :  { %2643 = vst [vmem:[#allocation9_spill] sm:$0xff] %v2278_v46  ;;  %2644 = vst [vmem:[#allocation10_spill] sm:$0xff] %v2285_v48  ;;  %v2295_v51 = vcombine.high %v2268_v43, %v2268_v43  ;;  %v2298_v52 = vrot.slane %v1050_v45, %v2156_v6  ;;  %v2302_v53 = vcombine.high %v2278_v46, %v2278_v46  ;;  %v1117_v54 = vsel %vm1115_vm1, %v2184_v17, 0.0 }
  0x25   :  { %v2308_v55 = vcombine.high %v2285_v48, %v2285_v48  ;;  %v1118_v56 = vadd.f32 %v1117_v54, %v1116_v50  ;;  %v1119_v57 = vsel %vm1115_vm1, %v2238_v34, 0.0  ;;  %v1121_v58 = vsel %vm1115_vm1, %v2265_v42, 0.0 }
  0x26   :  { %2645 = vst [vmem:[#allocation11_spill] sm:$0xff] %v2298_v52  ;;  %2646 = vst [vmem:[#allocation12_spill] sm:$0xff] %v2302_v53  ;;  %v2316_v59 = vcombine.high %v2298_v52, %v2298_v52  ;;  %v1123_v60 = vsel %vm1115_vm1, %v2199_v22, 0.0  ;;  %v1124_v61 = vsel %vm1115_vm1, %v2215_v27, 0.0  ;;  %v1126_v62 = vsel %vm1115_vm1, %v2259_v40, 0.0 }
  0x27   :  { %2647 = vst [vmem:[#allocation13_spill] sm:$0xff] %v2308_v55  ;;  %v1120_v63 = vadd.f32 %v1119_v57, %v1118_v56  ;;  %v1125_v0 = vadd.f32 %v1124_v61, %v1123_v60  ;;  %v1128_v1 = vsel %vm1115_vm1, %v2289_v49, 0.0  ;;  %v1130_v2 = vsel %vm1115_vm1, %v2195_v21, 0.0 }
  0x28   :  { %v1131_v3 = vsel %vm1115_vm1, %v2211_v26, 0.0  ;;  %v1133_v4 = vsel %vm1115_vm1, %v2255_v39, 0.0  ;;  %v1135_v5 = vsel %vm1115_vm1, %v2285_v48, 0.0  ;;  %v1137_v11 = vsel %vm1115_vm1, %v2228_v31, 0.0 }
  0x29   :  { %v1122_v13 = vadd.f32 %v1121_v58, %v1120_v63  ;;  %v1127_v16 = vadd.f32 %v1126_v62, %v1125_v0  ;;  %v1132_v18 = vadd.f32 %v1131_v3, %v1130_v2  ;;  %v1138_v33 = vsel %vm1115_vm1, %v2242_v35, 0.0 }
  0x2a   :  { %v1139_v37 = vadd.f32 %v1138_v33, %v1137_v11  ;;  %v1140_v41 = vsel %vm1115_vm1, %v2282_v47, 0.0  ;;  %v1142_v45 = vsel %vm1115_vm1, %v2308_v55, 0.0  ;;  %v1144_v50 = vsel %vm1115_vm1, %v2176_v14, 0.0 }
  0x2b   :  { %v1129_v54 = vadd.f32 %v1128_v1, %v1127_v16  ;;  %v1134_v56 = vadd.f32 %v1133_v4, %v1132_v18  ;;  %v1145_v57 = vsel %vm1115_vm1, %v2190_v19, 0.0  ;;  %v1147_v58 = vsel %vm1115_vm1, %v2252_v38, 0.0 }
  0x2c   :  { %v1141_v60 = vadd.f32 %v1140_v41, %v1139_v37  ;;  %v1146_v61 = vadd.f32 %v1145_v57, %v1144_v50  ;;  %v1149_v62 = vsel %vm1115_vm1, %v2278_v46, 0.0  ;;  %v1151_v63 = vsel %vm1115_vm1, %v2206_v24, 0.0 }
  0x2d   :  { %v1136_v0 = vadd.f32 %v1135_v5, %v1134_v56  ;;  %v1152_v2 = vsel %vm1115_vm1, %v2222_v29, 0.0  ;;  %v1154_v1 = vsel %vm1115_vm1, %v2272_v44, 0.0  ;;  %v1156_v3 = vsel %vm1115_vm1, %v2302_v53, 0.0 }
  0x2e   :  { %v1143_v4 = vadd.f32 %v1142_v45, %v1141_v60  ;;  %v1148_v11 = vadd.f32 %v1147_v58, %v1146_v61  ;;  %v1153_v16 = vadd.f32 %v1152_v2, %v1151_v63  ;;  %v1158_v18 = vsel %vm1115_vm1, %v2202_v23, 0.0 }
  0x2f   :  { %v1159_v33 = vsel %vm1115_vm1, %v2218_v28, 0.0  ;;  %v1161_v5 = vsel %vm1115_vm1, %v2268_v43, 0.0  ;;  %v1163_v37 = vsel %vm1115_vm1, %v2298_v52, 0.0  ;;  %v1165_v41 = vsel %vm1115_vm1, %v2232_v32, 0.0 }
  0x30   :  { %v1150_v50 = vadd.f32 %v1149_v62, %v1148_v11  ;;  %v1155_v56 = vadd.f32 %v1154_v1, %v1153_v16  ;;  %v1160_v45 = vadd.f32 %v1159_v33, %v1158_v18  ;;  %v1166_v57 = vsel %vm1115_vm1, %v2246_v36, 0.0 }
  0x31   :  { %v1167_v58 = vadd.f32 %v1166_v57, %v1165_v41  ;;  %v1168_v60 = vsel %vm1115_vm1, %v2295_v51, 0.0  ;;  %v1170_v61 = vsel %vm1115_vm1, %v2316_v59, 0.0  ;;  %v1187_v63 = vmul.f32 0.25, %v1122_v13 }
  0x32   :  { %v1157_v2 = vadd.f32 %v1156_v3, %v1155_v56  ;;  %v1162_v46 = vadd.f32 %v1161_v5, %v1160_v45  ;;  %v1188_v52 = vmul.f32 0.25, %v1129_v54  ;;  %v1189_v53 = vmul.f32 0.25, %v1136_v0 }
  0x33   :  { %v1169_v48 = vadd.f32 %v1168_v60, %v1167_v58  ;;  %v1190_v55 = vmul.f32 0.25, %v1143_v4  ;;  %v1191_v62 = vmul.f32 0.25, %v1150_v50  ;;  %v1815_v13 = vcombine.low %v2176_v14, %v2206_v24 }
  0x34   :  { %v1164_v11 = vadd.f32 %v1163_v37, %v1162_v46  ;;  %v1192_v16 = vmul.f32 0.25, %v1157_v2  ;;  %v1207_v18 = vcombine.low %v1187_v63, %v1188_v52  ;;  %v1816_v46 = vcombine.low %v2202_v23, %v2232_v32 }
  0x35   :  { %v1171_v41 = vadd.f32 %v1170_v61, %v1169_v48  ;;  %v1208_v57 = vcombine.low %v1189_v53, %v1190_v55  ;;  %v1823_v52 = vrot.slane %v1815_v13, %v2156_v6  ;;  %v1857_v24 = vcombine.low %v2190_v19, %v2222_v29 }
  0x36   :  { %v1193_v3 = vmul.f32 0.25, %v1164_v11  ;;  %v1215_v54 = vrot.slane %v1207_v18, %v2156_v6  ;;  %v1224_v0 = vcombine.low %v1191_v62, %v1192_v16  ;;  %v1830_v50 = vrot.slane %v1816_v46, %v2156_v6 }
  0x37   :  { %v1194_v4 = vmul.f32 0.25, %v1171_v41  ;;  %v1222_v5 = vrot.slane %v1208_v57, %v2156_v6  ;;  %v1858_v23 = vcombine.low %v2218_v28, %v2246_v36  ;;  %v1865_v32 = vrot.slane %v1857_v24, %v2156_v6 }
  0x38   :  { %v1232_v37 = vrot.slane %v1224_v0, %v2156_v6  ;;  %v1831_v19 = vcombine.low %v1823_v52, %v1830_v50 }
  0x39   :  { %v1223_v53 = vcombine.low %v1215_v54, %v1222_v5  ;;  %v1225_v55 = vcombine.low %v1193_v3, %v1194_v4  ;;  %v1872_v29 = vrot.slane %v1858_v23, %v2156_v6 }
  0x3a   :  { %1979 = vst [vmem:[#allocation6 + $0x8] sm:$0xff] %v1831_v19 }
  0x3b   :  { %v1239_v56 = vrot.slane %v1225_v55, %v2156_v6  ;;  %v1252_v45 = vsub.f32 %v2158_v7, %v1223_v53  ;;  %v1255_v58 = vsub.f32 %v2162_v9, %v1223_v53  ;;  %v1258_v60 = vsub.f32 %v2178_v15, %v1223_v53 }
  0x3c   :  { %v1261_v61 = vsub.f32 %v2208_v25, %v1223_v53  ;;  %v1873_v36 = vcombine.low %v1865_v32, %v1872_v29 }
  0x3d   :  { %v1240_v63 = vcombine.low %v1232_v37, %v1239_v56  ;;  %v1264_v2 = vmul.f32 %v1252_v45, %v1252_v45  ;;  %v1267_v62 = vmul.f32 %v1255_v58, %v1255_v58  ;;  %v1270_v11 = vmul.f32 %v1258_v60, %v1258_v60 }
  0x3e   :  { %v1273_v28 = vmul.f32 %v1261_v61, %v1261_v61  ;;  %1982 = vst [vmem:[#allocation6 + $0x1c] sm:$0xff] %v1873_v36 }
  0x3f   :  { %v1253_v7 = vsub.f32 %v2160_v8, %v1240_v63  ;;  %v1256_v9 = vsub.f32 %v2164_v10, %v1240_v63  ;;  %v1259_v15 = vsub.f32 %v2192_v20, %v1240_v63  ;;  %v1262_v25 = vsub.f32 %v2224_v30, %v1240_v63 }
  0x40   :  { %v1288_v18 = vcombine.high %v1264_v2, %v1264_v2  ;;  %v1295_v41 = vrot.slane %v1264_v2, %v2156_v6  ;;  %v1330_v57 = vcombine.high %v1267_v62, %v1267_v62  ;;  %v1337_v13 = vrot.slane %v1267_v62, %v2156_v6 }
  0x41   :  { %v1265_v3 = vmul.f32 %v1253_v7, %v1253_v7  ;;  %v1268_v54 = vmul.f32 %v1256_v9, %v1256_v9  ;;  %v1271_v0 = vmul.f32 %v1259_v15, %v1259_v15  ;;  %v1274_v4 = vmul.f32 %v1262_v25, %v1262_v25 }
  0x42   :  { %v1302_v5 = vrot.slane %v1288_v18, %v2156_v6  ;;  %v1303_v8 = vcombine.high %v1295_v41, %v1295_v41  ;;  %v1344_v10 = vrot.slane %v1330_v57, %v2156_v6  ;;  %v1345_v46 = vcombine.high %v1337_v13, %v1337_v13 }
  0x43   :  { %v1305_v20 = vcombine.high %v1265_v3, %v1265_v3  ;;  %v2413_v30 = vrot.slane %v1265_v3, %v2156_v6  ;;  %v1347_v52 = vcombine.high %v1268_v54, %v1268_v54  ;;  %v2416_v37 = vrot.slane %v1268_v54, %v2156_v6 }
  0x44   :  { %v1304_v24 = vcombine.high %v1302_v5, %v1302_v5  ;;  %v1346_v53 = vcombine.high %v1344_v10, %v1344_v10  ;;  %v1372_v55 = vcombine.high %v1270_v11, %v1270_v11  ;;  %v1379_v50 = vrot.slane %v1270_v11, %v2156_v6 }
  0x45   :  { %v2420_v23 = vrot.slane %v1305_v20, %v2156_v6  ;;  %v1320_v32 = vcombine.high %v2413_v30, %v2413_v30  ;;  %v2425_v56 = vrot.slane %v1347_v52, %v2156_v6  ;;  %v1362_v45 = vcombine.high %v2416_v37, %v2416_v37 }
  0x46   :  { %v1386_v58 = vrot.slane %v1372_v55, %v2156_v6  ;;  %v1387_v60 = vcombine.high %v1379_v50, %v1379_v50  ;;  %v1389_v61 = vcombine.high %v1271_v0, %v1271_v0  ;;  %v1396_v19 = vrot.slane %v1271_v0, %v2156_v6 }
  0x47   :  { %v1321_v29 = vcombine.high %v2420_v23, %v2420_v23  ;;  %v1363_v63 = vcombine.high %v2425_v56, %v2425_v56  ;;  %v1414_v2 = vcombine.high %v1273_v28, %v1273_v28  ;;  %v1421_v62 = vrot.slane %v1273_v28, %v2156_v6 }
  0x48   :  { %v1388_v11 = vcombine.high %v1386_v58, %v1386_v58  ;;  %v1403_v36 = vrot.slane %v1389_v61, %v2156_v6  ;;  %v1404_v7 = vcombine.high %v1396_v19, %v1396_v19  ;;  %v1431_v9 = vcombine.high %v1274_v4, %v1274_v4 }
  0x49   :  { %v1428_v15 = vrot.slane %v1414_v2, %v2156_v6  ;;  %v1429_v25 = vcombine.high %v1421_v62, %v1421_v62  ;;  %v1438_v18 = vrot.slane %v1274_v4, %v2156_v6  ;;  %v1496_v57 = vsel %vm1115_vm1, %v1295_v41, 0.0 }
  0x4a   :  { %v1405_v3 = vcombine.high %v1403_v36, %v1403_v36  ;;  %v1445_v54 = vrot.slane %v1431_v9, %v2156_v6  ;;  %v1497_v0 = vsel %vm1115_vm1, %v1337_v13, 0.0  ;;  %v1499_v20 = vsel %vm1115_vm1, %v1379_v50, 0.0 }
  0x4b   :  { %v1430_v28 = vcombine.high %v1428_v15, %v1428_v15  ;;  %v1446_v52 = vcombine.high %v1438_v18, %v1438_v18  ;;  %v1498_v55 = vadd.f32 %v1497_v0, %v1496_v57  ;;  %v1501_v61 = vsel %vm1115_vm1, %v1421_v62, 0.0 }
  0x4c   :  { %v1447_v14 = vcombine.high %v1445_v54, %v1445_v54  ;;  %v1503_v2 = vsel %vm1115_vm1, %v1303_v8, 0.0  ;;  %v1504_v48 = vsel %vm1115_vm1, %v1345_v46, 0.0  ;;  %v1506_v4 = vsel %vm1115_vm1, %v1387_v60, 0.0 }
  0x4d   :  { %v1500_v41 = vadd.f32 %v1499_v20, %v1498_v55  ;;  %v1505_v33 = vadd.f32 %v1504_v48, %v1503_v2  ;;  %v1508_v9 = vsel %vm1115_vm1, %v1429_v25, 0.0  ;;  %v1510_v13 = vsel %vm1115_vm1, %v1302_v5, 0.0 }
  0x4e   :  { %v1511_v50 = vsel %vm1115_vm1, %v1344_v10, 0.0  ;;  %v1513_v1 = vsel %vm1115_vm1, %v1386_v58, 0.0  ;;  %v1515_v57 = vsel %vm1115_vm1, %v1428_v15, 0.0  ;;  %v1517_v62 = vsel %vm1115_vm1, %v1304_v24, 0.0 }
  0x4f   :  { %v1502_v0 = vadd.f32 %v1501_v61, %v1500_v41  ;;  %v1507_v8 = vadd.f32 %v1506_v4, %v1505_v33  ;;  %v1512_v16 = vadd.f32 %v1511_v50, %v1510_v13  ;;  %v1518_v46 = vsel %vm1115_vm1, %v1346_v53, 0.0 }
  0x50   :  { %v1519_v60 = vadd.f32 %v1518_v46, %v1517_v62  ;;  %v1520_v48 = vsel %vm1115_vm1, %v1388_v11, 0.0  ;;  %v1522_v25 = vsel %vm1115_vm1, %v1430_v28, 0.0  ;;  %v1524_v5 = vsel %vm1115_vm1, %v2413_v30, 0.0 }
  0x51   :  { %v1509_v10 = vadd.f32 %v1508_v9, %v1507_v8  ;;  %v1514_v20 = vadd.f32 %v1513_v1, %v1512_v16  ;;  %v1525_v58 = vsel %vm1115_vm1, %v2416_v37, 0.0  ;;  %v1527_v24 = vsel %vm1115_vm1, %v1396_v19, 0.0 }
  0x52   :  { %v1521_v15 = vadd.f32 %v1520_v48, %v1519_v60  ;;  %v1526_v33 = vadd.f32 %v1525_v58, %v1524_v5  ;;  %v1529_v55 = vsel %vm1115_vm1, %v1438_v18, 0.0  ;;  %v1531_v53 = vsel %vm1115_vm1, %v1320_v32, 0.0 }
  0x53   :  { %v1516_v61 = vadd.f32 %v1515_v57, %v1514_v20  ;;  %v1532_v11 = vsel %vm1115_vm1, %v1362_v45, 0.0  ;;  %v1534_v28 = vsel %vm1115_vm1, %v1404_v7, 0.0  ;;  %v1536_v30 = vsel %vm1115_vm1, %v1446_v52, 0.0 }
  0x54   :  { %v1523_v2 = vadd.f32 %v1522_v25, %v1521_v15  ;;  %v1528_v1 = vadd.f32 %v1527_v24, %v1526_v33  ;;  %v1533_v16 = vadd.f32 %v1532_v11, %v1531_v53  ;;  %v1538_v37 = vsel %vm1115_vm1, %v2420_v23, 0.0 }
  0x55   :  { %v1539_v19 = vsel %vm1115_vm1, %v2425_v56, 0.0  ;;  %v1541_v18 = vsel %vm1115_vm1, %v1403_v36, 0.0  ;;  %v1543_v32 = vsel %vm1115_vm1, %v1445_v54, 0.0  ;;  %v1545_v4 = vsel %vm1115_vm1, %v1321_v29, 0.0 }
  0x56   :  { %v1530_v45 = vadd.f32 %v1529_v55, %v1528_v1  ;;  %v1535_v41 = vadd.f32 %v1534_v28, %v1533_v16  ;;  %v1540_v7 = vadd.f32 %v1539_v19, %v1538_v37  ;;  %v1546_v52 = vsel %vm1115_vm1, %v1363_v63, 0.0  ;;  %v2649_v19 = vld [vmem:[#allocation13_spill] sm:$0xff] }
  0x57   :  { %v1547_v9 = vadd.f32 %v1546_v52, %v1545_v4  ;;  %v1548_v13 = vsel %vm1115_vm1, %v1405_v3, 0.0  ;;  %v1550_v50 = vsel %vm1115_vm1, %v1447_v14, 0.0  ;;  %v1566_v23 = vmul.f32 0.33333334, %v1502_v0  ;;  %v2651_v4 = vld [vmem:[#allocation12_spill] sm:$0xff] }
  0x58   :  { %v1537_v57 = vadd.f32 %v1536_v30, %v1535_v41  ;;  %v1542_v62 = vadd.f32 %v1541_v18, %v1540_v7  ;;  %v1567_v56 = vmul.f32 0.33333334, %v1509_v10  ;;  %v1568_v8 = vmul.f32 0.33333334, %v1516_v61  ;;  %v2650_v18 = vld [vmem:[#allocation10_spill] sm:$0xff]  ;;  %v2653_v7 = vld [vmem:[#allocation11_spill] sm:$0xff] }
  0x59   :  { %v1549_v36 = vadd.f32 %v1548_v13, %v1547_v9  ;;  %v1569_v46 = vmul.f32 0.33333334, %v1523_v2  ;;  %v1570_v54 = vmul.f32 0.33333334, %v1530_v45  ;;  %v2476_v60 = vadd.f32 1e-08, %v1566_v23 }
  0x5a   :  { %v1544_v29 = vadd.f32 %v1543_v32, %v1542_v62  ;;  %v1571_v48 = vmul.f32 0.33333334, %v1537_v57  ;;  %v2478_v25 = vadd.f32 1e-08, %v1567_v56  ;;  %v2480_v63 = vadd.f32 1e-08, %v1568_v8 }
  0x5b   :  { %v1551_v5 = vadd.f32 %v1550_v50, %v1549_v36  ;;  %2059 = vrsqrt.f32 %v2476_v60  ;;  %v1883_v14 = vcombine.low %v2255_v39, %v2282_v47  ;;  %v2485_v0 = vadd.f32 1e-08, %v1569_v46  ;;  %v2652_v45 = vld [vmem:[#allocation9_spill] sm:$0xff] }
  0x5c   :  { %v1572_v3 = vmul.f32 0.33333334, %v1544_v29  ;;  %v2487_v20 = vadd.f32 1e-08, %v1570_v54  ;;  %2061 = vrsqrt.f32 %v2478_v25  ;;  %v2490_v58 = vadd.f32 1e-08, %v1571_v48 }
  0x5d   :  { %v1573_v10 = vmul.f32 0.33333334, %v1551_v5  ;;  %2063 = vrsqrt.f32 %v2480_v63  ;;  %v2648_v24 = vcombine.low %v2238_v34, %v2259_v40  ;;  %vm1588_vm2 = vcmp.eq.f32.partialorder %v2476_v60, inf }
  0x5e   :  { %v2497_v33 = vadd.f32 1e-08, %v1572_v3  ;;  %vm1590_vm3 = vcmp.eq.f32.partialorder %v2476_v60, 0.0  ;;  %v1897_v39 = vrot.slane %v1883_v14, %v2156_v6  ;;  %v1591_v55 = vand.u32 2147483648, %v2476_v60 }
  0x5f   :  { %v1890_v15 = vrot.slane %v2648_v24, %v2156_v6  ;;  %v2502_v47 = vadd.f32 1e-08, %v1573_v10  ;;  %vm1595_vm4 = vcmp.eq.f32.partialorder %v2478_v25, inf  ;;  %2065 = vrsqrt.f32 %v2485_v0 }
  0x60   :  { %vm1597_vm5 = vcmp.eq.f32.partialorder %v2478_v25, 0.0  ;;  %v1598_v34 = vand.u32 2147483648, %v2478_v25  ;;  %vm1602_vm6 = vcmp.eq.f32.partialorder %v2480_v63, inf  ;;  %2067 = vrsqrt.f32 %v2487_v20 }
  0x61   :  { %vm1604_vm7 = vcmp.eq.f32.partialorder %v2480_v63, 0.0  ;;  %v1605_v40 = vand.u32 2147483648, %v2480_v63  ;;  %vm1609_vm8 = vcmp.eq.f32.partialorder %v2485_v0, inf  ;;  %2069 = vrsqrt.f32 %v2490_v58 }
  0x62   :  { %vm1611_vm9 = vcmp.eq.f32.partialorder %v2485_v0, 0.0  ;;  %v1612_v53 = vand.u32 2147483648, %v2485_v0  ;;  %vm1616_vm10 = vcmp.eq.f32.partialorder %v2487_v20, inf  ;;  %2071 = vrsqrt.f32 %v2497_v33 }
  0x63   :  { %vm1618_vm11 = vcmp.eq.f32.partialorder %v2487_v20, 0.0  ;;  %v1619_v61 = vand.u32 2147483648, %v2487_v20  ;;  %vm1623_vm12 = vcmp.eq.f32.partialorder %v2490_v58, inf  ;;  %v1626_v11 = vand.u32 2147483648, %v2490_v58 }
  0x64   :  { %2073 = vrsqrt.f32 %v2502_v47  ;;  %vm1625_vm13 = vcmp.eq.f32.partialorder %v2490_v58, 0.0  ;;  %vm1630_vm14 = vcmp.eq.f32.partialorder %v2497_v33, inf  ;;  %v1898_v30 = vcombine.low %v1890_v15, %v1897_v39 }
  0x65   :  { %v2060_v28 = vpop.eup %2059  ;;  %v1899_v2 = vcombine.low %v2252_v38, %v2272_v44  ;;  %v1900_v1 = vcombine.low %v2268_v43, %v2295_v51  ;;  %v1924_v16 = vcombine.low %v2265_v42, %v2289_v49  ;;  %vm1632_vm15 = vcmp.eq.f32.partialorder %v2497_v33, 0.0 }
  0x66   :  { %v1587_v37 = vmul.f32 %v2060_v28, %v2476_v60  ;;  %v1925_v32 = vcombine.low %v2650_v18, %v2649_v19  ;;  %v1941_v41 = vcombine.low %v2652_v45, %v2651_v4  ;;  %v1942_v52 = vcombine.low %v2653_v7, %v2316_v59  ;;  %v2062_v38 = vpop.eup %2061  ;;  %1984 = vst [vmem:[#allocation6 + $0x28] sm:$0xff] %v1898_v30 }
  0x67   :  { %v1633_v44 = vand.u32 2147483648, %v2497_v33  ;;  %v1907_v43 = vrot.slane %v1899_v2, %v2156_v6  ;;  %v1914_v42 = vrot.slane %v1900_v1, %v2156_v6  ;;  %v1932_v49 = vrot.slane %v1924_v16, %v2156_v6  ;;  %v2064_v51 = vpop.eup %2063 }
  0x68   :  { %v1589_v9 = vsel %vm1588_vm2, %v2476_v60, %v1587_v37  ;;  %v1594_v13 = vmul.f32 %v2062_v38, %v2478_v25  ;;  %v1939_v50 = vrot.slane %v1925_v32, %v2156_v6  ;;  %v1949_v59 = vrot.slane %v1941_v41, %v2156_v6 }
  0x69   :  { %v1592_v23 = vsel %vm1590_vm3, %v1591_v55, %v1589_v9  ;;  %v1601_v57 = vmul.f32 %v2064_v51, %v2480_v63  ;;  %v1915_v62 = vcombine.low %v1907_v43, %v1914_v42  ;;  %v1956_v56 = vrot.slane %v1942_v52, %v2156_v6  ;;  %v2066_v8 = vpop.eup %2065 }
  0x6a   :  { %v1596_v36 = vsel %vm1595_vm4, %v2478_v25, %v1594_v13  ;;  %vm1637_vm2 = vcmp.eq.f32.partialorder %v2502_v47, inf  ;;  %v1667_v46 = vsel %vm1115_vm1, %v1592_v23, 0.0  ;;  %v1940_v54 = vcombine.low %v1932_v49, %v1939_v50  ;;  %v2068_v29 = vpop.eup %2067 }
  0x6b   :  { %v1599_v60 = vsel %vm1597_vm5, %v1598_v34, %v1596_v36  ;;  %v1603_v48 = vsel %vm1602_vm6, %v2480_v63, %v1601_v57  ;;  %v1608_v5 = vmul.f32 %v2066_v8, %v2485_v0  ;;  %v1957_v14 = vcombine.low %v1949_v59, %v1956_v56  ;;  %1985 = vst [vmem:[#allocation6 + $0x30] sm:$0xff] %v1915_v62  ;;  %v2070_v3 = vpop.eup %2069 }
  0x6c   :  { %v1606_v10 = vsel %vm1604_vm7, %v1605_v40, %v1603_v48  ;;  %v1615_v24 = vmul.f32 %v2068_v29, %v2487_v20  ;;  %vm1639_vm3 = vcmp.eq.f32.partialorder %v2502_v47, 0.0  ;;  %v1668_v15 = vsel %vm1115_vm1, %v1599_v60, 0.0  ;;  %1987 = vst [vmem:[#allocation6 + $0x3c] sm:$0xff] %v1940_v54  ;;  %v2072_v25 = vpop.eup %2071 }
  0x6d   :  { %v1610_v39 = vsel %vm1609_vm8, %v2485_v0, %v1608_v5  ;;  %v1622_v55 = vmul.f32 %v2070_v3, %v2490_v58  ;;  %v1669_v34 = vadd.f32 %v1668_v15, %v1667_v46  ;;  %v1670_v28 = vsel %vm1115_vm1, %v1606_v10, 0.0  ;;  %1988 = vst [vmem:[#allocation6 + $0x44] sm:$0xff] %v1957_v14 }
  0x6e   :  { %v2074_v63 = vpop.eup %2073  ;;  %v1613_v40 = vsel %vm1611_vm9, %v1612_v53, %v1610_v39  ;;  %v1617_v30 = vsel %vm1616_vm10, %v2487_v20, %v1615_v24  ;;  %v1629_v2 = vmul.f32 %v2072_v25, %v2497_v33  ;;  %v1640_v1 = vand.u32 2147483648, %v2502_v47 }
  0x6f   :  { %v1620_v16 = vsel %vm1618_vm11, %v1619_v61, %v1617_v30  ;;  %v1624_v37 = vsel %vm1623_vm12, %v2490_v58, %v1622_v55  ;;  %v1636_v19 = vmul.f32 %v2074_v63, %v2502_v47  ;;  %v1671_v18 = vadd.f32 %v1670_v28, %v1669_v34 }
  0x70   :  { %v1627_v0 = vsel %vm1625_vm13, %v1626_v11, %v1624_v37  ;;  %v1631_v53 = vsel %vm1630_vm14, %v2497_v33, %v1629_v2  ;;  %v1672_v32 = vsel %vm1115_vm1, %v1613_v40, 0.0  ;;  %v1674_v4 = vsel %vm1115_vm1, %v1620_v16, 0.0 }
  0x71   :  { %v1634_v20 = vsel %vm1632_vm15, %v1633_v44, %v1631_v53  ;;  %v1638_v61 = vsel %vm1637_vm2, %v2502_v47, %v1636_v19  ;;  %v1673_v45 = vadd.f32 %v1672_v32, %v1671_v18  ;;  %v1676_v41 = vsel %vm1115_vm1, %v1627_v0, 0.0  ;;  %v1656_v44 = vld [vmem:[#allocation2] sm:$0x3] }
  0x72   :  { %v1641_v58 = vsel %vm1639_vm3, %v1640_v1, %v1638_v61  ;;  %v1678_v7 = vsel %vm1115_vm1, %v1634_v20, 0.0  ;;  %v2129_v33 = vmov 0   ;;  %v2654_v47 = vcombine.low %v2170_v12, %v2199_v22 }
  0x73   :  { %v1675_v11 = vadd.f32 %v1674_v4, %v1673_v45  ;;  %v1680_v38 = vsel %vm1115_vm1, %v1641_v58, 0.0  ;;  %2050 = vset.pattern.permute.xlu0 %v2129_v33  ;;  %v2655_v13 = vcombine.low %v2195_v21, %v2228_v31  ;;  %v2656_v59 = vcombine.low %v2184_v17, %v2215_v27 }
  0x74   :  { %v1806_v9 = vrot.slane %v2654_v47, %v2156_v6  ;;  %v2657_v57 = vcombine.low %v2211_v26, %v2242_v35 }
  0x75   :  { %v1677_v52 = vadd.f32 %v1676_v41, %v1675_v11  ;;  %v1813_v50 = vrot.slane %v2655_v13, %v2156_v6  ;;  %v1848_v23 = vrot.slane %v2656_v59, %v2156_v6 }
  0x76   :  { %v1855_v62 = vrot.slane %v2657_v57, %v2156_v6 }
  0x77   :  { %v1679_v43 = vadd.f32 %v1678_v7, %v1677_v52  ;;  %v1814_v12 = vcombine.low %v1806_v9, %v1813_v50 }
  0x78   :  { %v1856_v22 = vcombine.low %v1848_v23, %v1855_v62 }
  0x79   :  { %v1681_v42 = vadd.f32 %v1680_v38, %v1679_v43  ;;  %1978 = vst [vmem:[#allocation6] sm:$0xff] %v1814_v12 }
  0x7a   :  { %1981 = vst [vmem:[#allocation6 + $0x14] sm:$0xff] %v1856_v22 }
  0x7b   :  { %1686 = vadd.xlane.f32.xlu0 %v1681_v42 }
 0x108   :  { %v1687_v49 = vpop.xlane.xlu0 %1686 }
 0x109   :  { %v1688_v51 = vadd.f32 %v1687_v49, %v1656_v44 }
 0x10b   :  { %1690 = vst.msk [vmem:[#allocation2] sm:$0x3] %vm28_vm0, %v1688_v51 }
 0x112   :  { %v1691_v56 = vld [vmem:[#allocation2] sm:$0x3] }
 0x113   :  { %v1692_v8 = vmul.f32 0.0009765625, %v1691_v56 }
 0x115   :  { %1695 = vperm.xlu0 %2050, %v1692_v8  }
 0x194   :  { %v1696_v21 = vpop.permute.xlu0 %1695 }
 0x195   :  { %v1832_v31 = vcombine.low %v1696_v21, %v1696_v21 }
 0x197   :  { %2037 = vst.sshfl [vmem:[#allocation6 + $0x10] sm:$0x33 pattern:$0x76325410] %v1832_v31 }
 0x198   :  { %2038 = vst.sshfl [vmem:[#allocation6 + $0x24] sm:$0x33 pattern:$0x76325410] %v1832_v31 }
 0x199   :  { %2039 = vst.sshfl [vmem:[#allocation6 + $0x38] sm:$0x33 pattern:$0x76325410] %v1832_v31 }
 0x19a   :  { %2040 = vst.sshfl [vmem:[#allocation6 + $0x4c] sm:$0x33 pattern:$0x76325410] %v1832_v31 }
 0x19b   :  { %2108 = shalt.err (!%p2105_p12)
}
 0x19c   :  { %s2109_s26 = scalar_lea.hbm %s2637_s1, 1280 }
 0x19d   :  { %p2110_p13 = scmp.ne.s32.totalorder %s2637_s1, %s2109_s26  ;;  %p2113_p0 = scmp.lt.u32.totalorder %s2109_s26, %s2637_s1 }
 0x19f   :  { %p2115_p1 = pnand %p2113_p0, %p2110_p13 }
 0x1a1   :  { %2118 = shalt.err (!%p2115_p1)
}
 0x1a2   :  { %s2131_s2 = smov 20  }
 0x1a3   :  { %2031 = dma.vmem_to_hbm [thread:$0]  %s2026_s22, 1280, %s2637_s1, [#allocation5], %s2125_s18, %s2125_s18, %s2131_s2  }
 0x1a4   :  { %2121 = dma.done.wait [#allocation5], 1280  }
 0x1a5   :  { %2122 = vsyncadd [#allocation5], 4294966016 }
 0x1a6   :  { %2035 = vsyncpa [#allocation4], 1 }
 0x1a7   :  { %2036 = vsyncpa [#allocation5], 1 }

</bundles_post_ra>
